<compile_context>
chip_gen: v6e
topology: v6e:2x2x1
jax: 0.10.0
libtpu: 0.0.40
codegen_flags: <defaults>
</compile_context>

<pallas_src>
import jax
import jax.numpy as jnp
from jax import lax
from jax.experimental import pallas as pl
from jax.experimental.pallas import tpu as pltpu


def _gating_kernel(x_ref, ly_ref, lp_ref, w1a_ref, w1f_ref, b1_ref,
                   w2t_ref, b2t_ref, o_ref):
    # x: [TB, D], ly/lp: [TB, 1], w1a: [D, H], w1f: [2, H], b1: [1, H],
    # w2t: [E, H], b2t: [E, 1], o: [E, TB]  (output transposed: lane axis = batch)
    x = x_ref[...].astype(jnp.float32)
    ly = ly_ref[...].astype(jnp.float32)
    lp = lp_ref[...].astype(jnp.float32)

    # Hidden layer: Linear(D+2 -> H) with the concat folded in as two rank-1
    # updates (flag columns of W1), then bias + ReLU.
    h = jnp.dot(x, w1a_ref[...], preferred_element_type=jnp.float32)   # [TB, H]
    h = h + ly * w1f_ref[0:1, :] + lp * w1f_ref[1:2, :] + b1_ref[...]
    h = jnp.maximum(h, 0.0)

    # Output layer computed directly in transposed orientation (a @ b.T MXU
    # pattern): logits_t[e, b] = sum_k w2[k, e] * h[b, k]
    logits_t = lax.dot_general(
        w2t_ref[...], h,
        dimension_numbers=(((1,), (1,)), ((), ())),
        preferred_element_type=jnp.float32)                            # [E, TB]
    logits_t = logits_t + b2t_ref[...]

    # Numerically-stable softmax over experts (sublane axis 0).
    m = jnp.max(logits_t, axis=0, keepdims=True)                       # [1, TB]
    e = jnp.exp(logits_t - m)
    denom = jnp.sum(e, axis=0, keepdims=True)                          # [1, TB]
    o_ref[...] = (e * pl.reciprocal(denom, approx=False)).astype(o_ref.dtype)


def gating_network(audio_summary, has_lyrics, has_loop, params, *, block_b=None):
    """audio_summary: [B, D], has_lyrics/has_loop: [B] -> weights [B, n_experts]."""
    w1, b1, w2, b2 = params          # w1: [D+2, H], b1: [1, H], w2: [H, E], b2: [1, E]
    B, D = audio_summary.shape
    H = w1.shape[1]
    E = w2.shape[1]

    # Split W1 consistently with the original concat order [audio, lyrics, loop].
    w1_audio = w1[:D, :]             # [D, H]
    w1_flags = w1[D:, :]             # [2, H]  (row 0 = has_lyrics, row 1 = has_loop)
    w2_t = w2.T                      # [E, H]  (tiny one-time param transpose)
    b2_t = b2.T                      # [E, 1]

    x = audio_summary.astype(jnp.float32)
    ly = has_lyrics.astype(jnp.float32).reshape(B, 1)
    lp = has_loop.astype(jnp.float32).reshape(B, 1)

    # Batch tile: whole batch when small; 1024-row tiles (multiple of 8
    # sublanes / 128 lanes) when large.  2 buffers x 1024 x D x 4B plus the
    # resident weights stays far below the 32 MiB scoped-VMEM default on all
    # of v5e / v6e / v7x for realistic audio_dim.
    if block_b is None:
        block_b = B if B <= 1024 else 1024
    grid = (pl.cdiv(B, block_b),)

    const = lambda i: (0, 0)         # weights/biases resident across the grid
    out_t = pl.pallas_call(
        _gating_kernel,
        out_shape=jax.ShapeDtypeStruct((E, B), jnp.float32),
        grid=grid,
        in_specs=[
            pl.BlockSpec((block_b, D), lambda i: (i, 0)),   # audio_summary tile
            pl.BlockSpec((block_b, 1), lambda i: (i, 0)),   # has_lyrics column
            pl.BlockSpec((block_b, 1), lambda i: (i, 0)),   # has_loop column
            pl.BlockSpec((D, H), const),                    # W1[:D]
            pl.BlockSpec((2, H), const),                    # W1[D:]
            pl.BlockSpec((1, H), const),                    # b1
            pl.BlockSpec((E, H), const),                    # W2^T
            pl.BlockSpec((E, 1), const),                    # b2^T
        ],
        out_specs=pl.BlockSpec((E, block_b), lambda i: (0, i)),
        compiler_params=pltpu.CompilerParams(
            dimension_semantics=("parallel",),              # no reduction axis
        ),
    )(x, ly, lp, w1_audio, w1_flags, b1, w2_t, b2_t)

    return out_t.T                   # back to [B, E] to match the module contract


def init_params(key, audio_dim, n_experts=4, hidden_dim=32):
    """Deterministic init matching nn.Linear default (uniform +/- 1/sqrt(fan_in))."""
    in1 = audio_dim + 2
    k1, k2, k3, k4 = jax.random.split(key, 4)
    lim1 = 1.0 / jnp.sqrt(in1)
    lim2 = 1.0 / jnp.sqrt(hidden_dim)
    w1 = jax.random.uniform(k1, (in1, hidden_dim), jnp.float32, -lim1, lim1)
    b1 = jax.random.uniform(k2, (1, hidden_dim), jnp.float32, -lim1, lim1)
    w2 = jax.random.uniform(k3, (hidden_dim, n_experts), jnp.float32, -lim2, lim2)
    b2 = jax.random.uniform(k4, (1, n_experts), jnp.float32, -lim2, lim2)
    return w1, b1, w2, b2


if __name__ == "__main__":
    key = jax.random.PRNGKey(0)
    k_params, k_audio, k_ly, k_lp = jax.random.split(key, 4)

    B, audio_dim, n_experts, hidden_dim = 2, 16, 4, 32

    params = init_params(k_params, audio_dim, n_experts, hidden_dim)
    audio_summary = jax.random.normal(k_audio, (B, audio_dim), jnp.float32)
    has_lyrics = jax.random.bernoulli(k_ly, 0.5, (B,)).astype(jnp.float32)
    has_loop = jax.random.bernoulli(k_lp, 0.5, (B,)).astype(jnp.float32)

    weights = gating_network(audio_summary, has_lyrics, has_loop, params)
    weights = jax.block_until_ready(weights)

    # Pure-JAX reference (mirrors the PyTorch module exactly).
    w1, b1, w2, b2 = params
    x = jnp.concatenate(
        [audio_summary, jnp.stack([has_lyrics, has_loop], axis=1)], axis=1)
    h = jnp.maximum(x @ w1 + b1, 0.0)
    ref = jax.nn.softmax(h @ w2 + b2, axis=1)

    assert weights.shape == (B, n_experts)
    assert jnp.allclose(weights, ref, atol=1e-5), "mismatch vs reference"
    assert jnp.allclose(jnp.sum(weights, axis=1), 1.0, atol=1e-5)

    print("KERNEL_OK")
</pallas_src>

<mosaic_0001>
module attributes {stable_mosaic.version = 11 : i64} {
  func.func @_gating_kernel(%arg0: i32, %arg1: memref<2x16xf32, #tpu.memory_space<vmem>>, %arg2: memref<2x1xf32, #tpu.memory_space<vmem>>, %arg3: memref<2x1xf32, #tpu.memory_space<vmem>>, %arg4: memref<16x32xf32, #tpu.memory_space<vmem>>, %arg5: memref<2x32xf32, #tpu.memory_space<vmem>>, %arg6: memref<1x32xf32, #tpu.memory_space<vmem>>, %arg7: memref<4x32xf32, #tpu.memory_space<vmem>>, %arg8: memref<4x1xf32, #tpu.memory_space<vmem>>, %arg9: memref<4x2xf32, #tpu.memory_space<vmem>>) attributes {dimension_semantics = [#tpu.dimension_semantics<parallel>], iteration_bounds = array<i64: 1>, scalar_prefetch = 0 : i64, scratch_operands = 0 : i64, tpu.core_type = #tpu.core_type<tc>, window_params = [{transform_indices = @transform_0, window_bounds = array<i64: 2, 16>}, {transform_indices = @transform_1, window_bounds = array<i64: 2, 1>}, {transform_indices = @transform_2, window_bounds = array<i64: 2, 1>}, {pipeline_mode = #tpu.pipeline_mode<synchronous>, transform_indices = @transform_3, window_bounds = array<i64: 16, 32>}, {pipeline_mode = #tpu.pipeline_mode<synchronous>, transform_indices = @transform_4, window_bounds = array<i64: 2, 32>}, {pipeline_mode = #tpu.pipeline_mode<synchronous>, transform_indices = @transform_5, window_bounds = array<i64: 1, 32>}, {pipeline_mode = #tpu.pipeline_mode<synchronous>, transform_indices = @transform_6, window_bounds = array<i64: 4, 32>}, {pipeline_mode = #tpu.pipeline_mode<synchronous>, transform_indices = @transform_7, window_bounds = array<i64: 4, 1>}, {transform_indices = @transform_8, window_bounds = array<i64: 4, 2>}]} {
    %c0 = arith.constant 0 : index
    %c0_0 = arith.constant 0 : index
    %0 = vector.load %arg1[%c0, %c0_0] : memref<2x16xf32, #tpu.memory_space<vmem>>, vector<2x16xf32>
    %c0_1 = arith.constant 0 : index
    %c0_2 = arith.constant 0 : index
    %1 = vector.load %arg2[%c0_1, %c0_2] : memref<2x1xf32, #tpu.memory_space<vmem>>, vector<2x1xf32>
    %c0_3 = arith.constant 0 : index
    %c0_4 = arith.constant 0 : index
    %2 = vector.load %arg3[%c0_3, %c0_4] : memref<2x1xf32, #tpu.memory_space<vmem>>, vector<2x1xf32>
    %c0_5 = arith.constant 0 : index
    %c0_6 = arith.constant 0 : index
    %3 = vector.load %arg4[%c0_5, %c0_6] : memref<16x32xf32, #tpu.memory_space<vmem>>, vector<16x32xf32>
    %cst = arith.constant dense<0.000000e+00> : vector<2x32xf32>
    %4 = tpu.matmul %0, %3, %cst {dimension_numbers = #tpu.dot_dimension_numbers<[1], [0], [0], [1], [0, 0, 1, 1], [], []>} : vector<2x16xf32>, vector<16x32xf32>, vector<2x32xf32> -> vector<2x32xf32>
    %c0_7 = arith.constant 0 : index
    %c0_8 = arith.constant 0 : index
    %5 = vector.load %arg5[%c0_7, %c0_8] : memref<2x32xf32, #tpu.memory_space<vmem>>, vector<1x32xf32>
    %6 = vector.broadcast %1 : vector<2x1xf32> to vector<2x32xf32>
    %7 = vector.broadcast %5 : vector<1x32xf32> to vector<2x32xf32>
    %8 = arith.mulf %6, %7 : vector<2x32xf32>
    %9 = arith.addf %4, %8 : vector<2x32xf32>
    %c1 = arith.constant 1 : index
    %c0_9 = arith.constant 0 : index
    %10 = vector.load %arg5[%c1, %c0_9] : memref<2x32xf32, #tpu.memory_space<vmem>>, vector<1x32xf32>
    %11 = vector.broadcast %2 : vector<2x1xf32> to vector<2x32xf32>
    %12 = vector.broadcast %10 : vector<1x32xf32> to vector<2x32xf32>
    %13 = arith.mulf %11, %12 : vector<2x32xf32>
    %14 = arith.addf %9, %13 : vector<2x32xf32>
    %c0_10 = arith.constant 0 : index
    %c0_11 = arith.constant 0 : index
    %15 = vector.load %arg6[%c0_10, %c0_11] : memref<1x32xf32, #tpu.memory_space<vmem>>, vector<1x32xf32>
    %16 = vector.broadcast %15 : vector<1x32xf32> to vector<2x32xf32>
    %17 = arith.addf %14, %16 : vector<2x32xf32>
    %cst_12 = arith.constant 0.000000e+00 : f32
    %18 = vector.broadcast %cst_12 : f32 to vector<2x32xf32>
    %19 = arith.maximumf %17, %18 : vector<2x32xf32>
    %c0_13 = arith.constant 0 : index
    %c0_14 = arith.constant 0 : index
    %20 = vector.load %arg7[%c0_13, %c0_14] : memref<4x32xf32, #tpu.memory_space<vmem>>, vector<4x32xf32>
    %cst_15 = arith.constant dense<0.000000e+00> : vector<4x2xf32>
    %21 = tpu.matmul %20, %19, %cst_15 {dimension_numbers = #tpu.dot_dimension_numbers<[1], [1], [0], [0], [0, 0, 1, 0], [], []>} : vector<4x32xf32>, vector<2x32xf32>, vector<4x2xf32> -> vector<4x2xf32>
    %c0_16 = arith.constant 0 : index
    %c0_17 = arith.constant 0 : index
    %22 = vector.load %arg8[%c0_16, %c0_17] : memref<4x1xf32, #tpu.memory_space<vmem>>, vector<4x1xf32>
    %23 = vector.broadcast %22 : vector<4x1xf32> to vector<4x2xf32>
    %24 = arith.addf %21, %23 : vector<4x2xf32>
    %cst_18 = arith.constant dense<0xFF800000> : vector<2xf32>
    %25 = vector.multi_reduction <maximumf>, %24, %cst_18 [0] : vector<4x2xf32> to vector<2xf32>
    %26 = vector.shape_cast %25 : vector<2xf32> to vector<1x2xf32>
    %27 = vector.broadcast %26 : vector<1x2xf32> to vector<4x2xf32>
    %28 = arith.subf %24, %27 : vector<4x2xf32>
    %29 = math.exp %28 : vector<4x2xf32>
    %cst_19 = arith.constant dense<0.000000e+00> : vector<2xf32>
    %30 = vector.multi_reduction <add>, %29, %cst_19 [0] : vector<4x2xf32> to vector<2xf32>
    %31 = vector.shape_cast %30 : vector<2xf32> to vector<1x2xf32>
    %32 = tpu.reciprocal %31 : vector<1x2xf32> -> vector<1x2xf32>
    %33 = vector.broadcast %32 : vector<1x2xf32> to vector<4x2xf32>
    %34 = arith.mulf %29, %33 : vector<4x2xf32>
    %c0_20 = arith.constant 0 : index
    %c0_21 = arith.constant 0 : index
    %35 = vector.load %arg9[%c0_20, %c0_21] : memref<4x2xf32, #tpu.memory_space<vmem>>, vector<4x2xf32>
    tpu.vector_store %arg9[%c0_20, %c0_21], %34 {strides = array<i32>} : memref<4x2xf32, #tpu.memory_space<vmem>>, vector<4x2xf32>,
    return
  }
  func.func @transform_0(%arg0: i32) -> (i32, i32) {
    %c0_i32 = arith.constant 0 : i32
    %c0_i32_0 = arith.constant 0 : i32
    return %arg0, %c0_i32 : i32, i32
  }
  func.func @transform_1(%arg0: i32) -> (i32, i32) {
    %c0_i32 = arith.constant 0 : i32
    %c0_i32_0 = arith.constant 0 : i32
    return %arg0, %c0_i32 : i32, i32
  }
  func.func @transform_2(%arg0: i32) -> (i32, i32) {
    %c0_i32 = arith.constant 0 : i32
    %c0_i32_0 = arith.constant 0 : i32
    return %arg0, %c0_i32 : i32, i32
  }
  func.func @transform_3(%arg0: i32) -> (i32, i32) {
    %c0_i32 = arith.constant 0 : i32
    %c0_i32_0 = arith.constant 0 : i32
    %c0_i32_1 = arith.constant 0 : i32
    return %c0_i32, %c0_i32_0 : i32, i32
  }
  func.func @transform_4(%arg0: i32) -> (i32, i32) {
    %c0_i32 = arith.constant 0 : i32
    %c0_i32_0 = arith.constant 0 : i32
    %c0_i32_1 = arith.constant 0 : i32
    return %c0_i32, %c0_i32_0 : i32, i32
  }
  func.func @transform_5(%arg0: i32) -> (i32, i32) {
    %c0_i32 = arith.constant 0 : i32
    %c0_i32_0 = arith.constant 0 : i32
    %c0_i32_1 = arith.constant 0 : i32
    return %c0_i32, %c0_i32_0 : i32, i32
  }
  func.func @transform_6(%arg0: i32) -> (i32, i32) {
    %c0_i32 = arith.constant 0 : i32
    %c0_i32_0 = arith.constant 0 : i32
    %c0_i32_1 = arith.constant 0 : i32
    return %c0_i32, %c0_i32_0 : i32, i32
  }
  func.func @transform_7(%arg0: i32) -> (i32, i32) {
    %c0_i32 = arith.constant 0 : i32
    %c0_i32_0 = arith.constant 0 : i32
    %c0_i32_1 = arith.constant 0 : i32
    return %c0_i32, %c0_i32_0 : i32, i32
  }
  func.func @transform_8(%arg0: i32) -> (i32, i32) {
    %c0_i32 = arith.constant 0 : i32
    %c0_i32_0 = arith.constant 0 : i32
    return %c0_i32, %arg0 : i32, i32
  }
}

</mosaic_0001>

<bundles_post_ra>
// kernel: tpu_custom_call.1
= control target key start
LH: loop header
LB: loop body
LE: loop exit
PB: predicated region body
PF: predicated region fallthrough
CT: control target
= control target key end

     0   :  { %13 = vsyncpa [#allocation3], 0  ;;  %s469_s0 = inlined_call_operand.hbm [shape: f32[2,16], index: 0, kind: input, shape index: {}]   ;;  %s470_s1 = inlined_call_operand.vmem [shape: f32[2,1], index: 1, kind: input, shape index: {}]   ;;  %s471_s2 = inlined_call_operand.vmem [shape: f32[2,1], index: 2, kind: input, shape index: {}]   ;;  %s472_s3 = inlined_call_operand.vmem [shape: f32[16,32], index: 3, kind: input, shape index: {}]   ;;  %s473_s4 = inlined_call_operand.hbm [shape: f32[2,32], index: 4, kind: input, shape index: {}]   ;;  %s474_s5 = inlined_call_operand.hbm [shape: f32[1,32], index: 5, kind: input, shape index: {}]   ;;  %s475_s6 = inlined_call_operand.vmem [shape: f32[4,32], index: 6, kind: input, shape index: {}]   ;;  %s476_s7 = inlined_call_operand.vmem [shape: f32[4,1], index: 7, kind: input, shape index: {}]   ;;  %s477_s8 = inlined_call_operand.vmem [shape: f32[4,2], index: 8, kind: output, shape index: {}]  }
   0x1   :  { %14 = vsyncpa [#allocation5], 0  ;;  %s385_s27 = smov [#allocation4]   ;;  %s386_s29 = smov [#allocation2]  }
   0x2   :  { %s37_s28 = sshll.u32 %s385_s27, 4  ;;  %s21_s30 = sshll.u32 %s386_s29, 4  ;;  %s38_s28 = int_to_ptr.vmem [resolvable:$true] %s37_s28  ;;  %s22_s30 = int_to_ptr.vmem [resolvable:$true] %s21_s30 }
   0x3   :  { %s329_s9 = scalar_lea.vmem %s38_s28, 32  ;;  %p334_p1 = scmp.lt.s32.totalorder %s38_s28, %s38_s28 }
   0x4   :  { %p330_p0 = scmp.ne.s32.totalorder %s38_s28, %s329_s9  ;;  %p335_p2 = scmp.lt.s32.totalorder %s329_s9, %s329_s9 }
   0x6   :  { %p336_p3 = por %p335_p2, %p334_p1 }
   0x8   :  { %p337_p4 = pnand %p336_p3, %p330_p0 }
   0xa   :  { %340 = shalt.err (!%p337_p4)
}
   0xb   :  { %40 = dma.hbm_to_vmem [thread:$0]  %s473_s4, 32, %s38_s28, [#allocation5]  }
   0xc   :  { %s349_s12 = scalar_lea.vmem %s22_s30, 32  ;;  %p354_p6 = scmp.lt.s32.totalorder %s22_s30, %s22_s30 }
   0xd   :  { %p350_p5 = scmp.ne.s32.totalorder %s22_s30, %s349_s12  ;;  %p355_p7 = scmp.lt.s32.totalorder %s349_s12, %s349_s12 }
   0xf   :  { %p356_p8 = por %p355_p7, %p354_p6 }
  0x11   :  { %p357_p9 = pnand %p356_p8, %p350_p5 }
  0x13   :  { %360 = shalt.err (!%p357_p9)
}
  0x14   :  { %24 = dma.hbm_to_vmem [thread:$0]  %s469_s0, 32, %s22_s30, [#allocation3]  }
  0x15   :  { %s387_s15 = smov [#allocation6]  }
  0x16   :  { %s47_s16 = sshll.u32 %s387_s15, 4  ;;  %s48_s16 = int_to_ptr.vmem [resolvable:$true] %s47_s16 }
  0x17   :  { %s369_s17 = scalar_lea.vmem %s48_s16, 16  ;;  %s373_s18 = scalar_lea.vmem %s48_s16, 32 }
  0x18   :  { %p370_p10 = scmp.ne.s32.totalorder %s48_s16, %s369_s17  ;;  %p374_p11 = scmp.lt.s32.totalorder %s48_s16, %s48_s16 }
  0x19   :  { %p375_p12 = scmp.lt.s32.totalorder %s373_s18, %s369_s17 }
  0x1b   :  { %p376_p13 = por %p375_p12, %p374_p11 }
  0x1d   :  { %p377_p0 = pnand %p376_p13, %p370_p10 }
  0x1f   :  { %380 = shalt.err (!%p377_p0)
}
  0x20   :  { %50 = dma.hbm_to_vmem [thread:$0]  %s474_s5, 16, %s48_s16, [#allocation5]  }
  0x21   :  { %381 = dma.done.wait [#allocation3], 32  }
  0x22   :  { %382 = vsyncadd [#allocation3], 4294967264 }
  0x23   :  { %383 = dma.done.wait [#allocation5], 48  }
  0x24   :  { %384 = vsyncadd [#allocation5], 4294967248  ;;  %v388_v0 = vmov 0.0   ;;  %vm389_vm0 = vmmov 0   ;;  %v390_v1 = vmov 0   ;;  %v68_v2 = vld [vmem:[%s472_s3 + $0x8] sm:$0xff] }
  0x25   :  { %297 = vmatprep.subr.mxu0 %v388_v0  ;;  %301 = vmatprep.mubr.msk.f32.mxu0 %vm389_vm0, %v388_v0  ;;  %v67_v3 = vld [vmem:[%s472_s3] sm:$0xff]  ;;  %vm80_vm1 = vcmask 130048   ;;  %vm182_vm2 = vcmask 261120   ;;  %vm259_vm3 = vcmask 11264  }
  0x26   :  { %315 = vset.pattern.permute.xlu0 %v390_v1  ;;  %304 = vmatprep.subr.mxu1 %v388_v0  ;;  %v64_v4 = vld [vmem:[#allocation2] sm:$0x3]  ;;  %v286_v9 = vld [vmem:[#allocation4] ss:$0 sm:$0xff]  ;;  %v288_v10 = vld [vmem:[#allocation4 + $0x1] ss:$0 sm:$0xff] }
  0x27   :  { %306 = vmatprep.mubr.msk.f32.mxu1 %vm389_vm0, %v388_v0  ;;  %316 = vset.pattern.permute.xlu1 %v390_v1  ;;  %v65_v5 = vld [vmem:[%s470_s1] sm:$0x3]  ;;  %v289_v17 = vld [vmem:[#allocation6] ss:$0 sm:$0xff] }
  0x28   :  { %298 = vmatpush3.msra.mxu0 %v68_v2  ;;  %72 = vperm.xlu0 %315, %v65_v5   ;;  %v66_v6 = vld [vmem:[%s471_s2] sm:$0x3] }
  0x29   :  { %299 = vmatprep.subr.mxu0 %v388_v0  ;;  %v176_v7 = vld [vmem:[%s476_s7] sm:$0xf] }
  0x2a   :  { %300 = vmatpush3.msra.mxu0 %v67_v3  ;;  %179 = vperm.xlu1 %316, %v176_v7   ;;  %v175_v21 = vld [vmem:[%s475_s6] sm:$0xf] }
  0x2b   :  { %302 = vmatmul.mubr.msk.f32.vlgmr.msra.gmra.mxu0 %vm80_vm1, %v64_v4 }
  0x2c   :  { %157 = vperm.xlu0 %315, %v66_v6  }
  0xa3   :  { %v73_v8 = vpop.permute.xlu0 %72 }
  0xa4   :  { %v79_v12 = vmul.f32 %v286_v9, %v73_v8 }
  0xa5   :  { %v180_v22 = vpop.permute.xlu1 %179 }
  0xa7   :  { %v158_v11 = vpop.permute.xlu0 %157 }
  0xa8   :  { %v164_v14 = vmul.f32 %v288_v10, %v158_v11 }
  0xeb   :  { %v150_v13 = vpop.f32.mrf.mxu0 }
  0xec   :  { %v151_v15 = vadd.f32 %v150_v13, %v79_v12 }
  0xed   :  { %v303_v16 = vpop.f32.mrf.mxu0 }
  0xee   :  { %v165_v18 = vadd.f32 %v164_v14, %v151_v15 }
  0xf0   :  { %v173_v19 = vadd.f32 %v289_v17, %v165_v18 }
  0xf2   :  { %v174_v20 = vmax.f32 %v173_v19, 0.0 }
  0xf4   :  { %305 = vmatpush3.xpose.msk.msra.mxu1 %vm182_vm2, %v174_v20 }
  0xf7   :  { %307 = vmatmul.mubr.msk.f32.vlgmr.msra.gmra.mxu1 %vm182_vm2, %v175_v21 }
 0x1b7   :  { %v255_v23 = vpop.f32.mrf.mxu1 }
 0x1b8   :  { %v256_v24 = vadd.f32 %v255_v23, %v180_v22 }
 0x1b9   :  { %v308_v25 = vpop.f32.mrf.mxu1 }
 0x1ba   :  { %v260_v26 = vsel %vm259_vm3, %v256_v24, -inf }
 0x1bb   :  { %v261_v27 = vrot.slane %v260_v26, 4 }
 0x1bd   :  { %v262_v28 = vmax.f32 %v260_v26, %v261_v27 }
 0x1bf   :  { %v263_v29 = vrot.slane %v262_v28, 2 }
 0x1c1   :  { %v264_v30 = vmax.f32 %v262_v28, %v263_v29 }
 0x1c3   :  { %v265_v31 = vrot.slane %v264_v30, 1 }
 0x1c5   :  { %v266_v32 = vmax.f32 %v264_v30, %v265_v31 }
 0x1c7   :  { %v267_v33 = vsub.f32 %v256_v24, %v266_v32 }
 0x1c9   :  { %v268_v34 = vmul.f32 1.442695, %v267_v33 }
 0x1cb   :  { %317 = vpow2.f32 %v268_v34 }
 0x1d8   :  { %v318_v35 = vpop.eup %317 }
 0x1d9   :  { %v270_v36 = vsel %vm259_vm3, %v318_v35, 0.0 }
 0x1da   :  { %v271_v37 = vrot.slane %v270_v36, 4 }
 0x1dc   :  { %v272_v38 = vadd.f32 %v271_v37, %v270_v36 }
 0x1de   :  { %v273_v39 = vrot.slane %v272_v38, 2 }
 0x1e0   :  { %v274_v40 = vadd.f32 %v273_v39, %v272_v38 }
 0x1e2   :  { %v275_v41 = vrot.slane %v274_v40, 1 }
 0x1e4   :  { %v276_v42 = vadd.f32 %v275_v41, %v274_v40 }
 0x1e6   :  { %319 = vrcp.f32 %v276_v42 }
 0x1f3   :  { %v320_v43 = vpop.eup %319 }
 0x1f4   :  { %v278_v44 = vmul.f32 %v320_v43, %v318_v35 }
 0x1f6   :  { %279 = vst.msk [vmem:[%s477_s8] sm:$0xf] %vm259_vm3, %v278_v44 }
 0x1f7   :  { %284 = vsyncpa [#allocation3], 1 }
 0x1f8   :  { %285 = vsyncpa [#allocation5], 1 }

</bundles_post_ra>
